<compile_context>
chip_gen: v6e
topology: v6e:2x2x1
jax: 0.10.0
libtpu: 0.0.40
codegen_flags: <defaults>
</compile_context>

<pallas_src>
import functools

import jax
import jax.numpy as jnp
from jax import lax
from jax.experimental import pallas as pl
from jax.experimental.pallas import tpu as pltpu

NUM_GROUPS = 32
GN_EPS = 1e-5
# Explicit scoped-VMEM budget with headroom for v7x (64 MiB physical).
VMEM_LIMIT_BYTES = 48 * 1024 * 1024


def _pick_tile_s(S, requested):
    """Largest spatial tile <= requested that is a multiple of 8 and divides S."""
    t = max(8, min(requested, S))
    t -= t % 8
    while t > 8 and S % t:
        t -= 8
    if t <= 0 or S % t:
        t = S  # fall back to whole-sample tile (full-extent slice is always legal)
    return t


def _star_block_kernel(x_ref, w12_ref, b12_ref, wg_ref, bg_ref, mask_ref,
                       gamma_ref, beta_ref, out_ref,
                       z_scr, sum_scr, sq_scr,
                       *, num_groups, tile_s, hidden, compute_dtype):
    # One grid step == one batch sample.  x_ref / out_ref are (S, C) (squeezed).
    S, C = z_scr.shape
    n_tiles = S // tile_s

    sum_scr[...] = jnp.zeros_like(sum_scr)
    sq_scr[...] = jnp.zeros_like(sq_scr)

    ones_row = jnp.ones((1, tile_s), jnp.float32)

    # ---- pass 1: tiled matmuls (fused f1+f2, star op, g) + stat accumulation
    @pl.loop(0, n_tiles)
    def _(t):
        row = pl.multiple_of(t * tile_s, tile_s)
        xt = x_ref[pl.ds(row, tile_s), :].astype(compute_dtype)           # (ts, C)

        # fused f1/f2 : one MXU matmul over concatenated weights
        x12 = jnp.dot(xt, w12_ref[...],
                      preferred_element_type=jnp.float32) + b12_ref[...]  # (ts, 2Hd)
        x1 = x12[:, :hidden]
        x2 = x12[:, hidden:]

        # star op: ReLU6(x1) * x2, cast straight to bf16 (only consumed by g)
        y = (jnp.clip(x1, 0.0, 6.0) * x2).astype(compute_dtype)           # (ts, Hd)

        # g : back to C channels, f32 accumulation
        zt = jnp.dot(y, wg_ref[...],
                     preferred_element_type=jnp.float32) + bg_ref[...]    # (ts, C)

        z_scr[pl.ds(row, tile_s), :] = zt

        # S-axis reductions ride the MXU (ones @ z) instead of a long XLU chain.
        sum_scr[...] += jnp.dot(ones_row, zt, preferred_element_type=jnp.float32)
        sq_scr[...] += jnp.dot(ones_row, zt * zt, preferred_element_type=jnp.float32)

    # ---- GroupNorm statistics: per-group reduce via same-group mask matmul
    group_sum = jnp.dot(sum_scr[...], mask_ref[...], preferred_element_type=jnp.float32)
    group_sq = jnp.dot(sq_scr[...], mask_ref[...], preferred_element_type=jnp.float32)
    cnt = jnp.float32(S * (C // num_groups))
    mean = group_sum / cnt                                   # (1, C), per-group value
    # One-pass moments kept in f32; clamp guards round-off going slightly negative.
    # TODO(synk): for very large activation magnitudes switch to two-pass stats.
    var = jnp.maximum(group_sq / cnt - mean * mean, 0.0)
    inv = lax.rsqrt(var + GN_EPS)

    # fold normalize + affine into a single FMA: zn = z * a + b
    a_scale = inv * gamma_ref[...]                           # (1, C)
    b_shift = beta_ref[...] - mean * a_scale                 # (1, C)

    # ---- pass 2: fused normalize-affine + residual, lane-dense stores
    @pl.loop(0, n_tiles)
    def _(t):
        row = pl.multiple_of(t * tile_s, tile_s)
        zt = z_scr[pl.ds(row, tile_s), :]
        xt = x_ref[pl.ds(row, tile_s), :].astype(jnp.float32)
        out_ref[pl.ds(row, tile_s), :] = (zt * a_scale + b_shift + xt).astype(out_ref.dtype)


def star_block_pallas(x_nsc, params, *, tile_s=256, compute_dtype=jnp.bfloat16):
    """Channels-last entry point. x_nsc: (N, S, C) float32 -> (N, S, C)."""
    N, S, C = x_nsc.shape
    Hd = params["w1"].shape[1]
    assert C % NUM_GROUPS == 0, "GroupNorm(32, C) needs C % 32 == 0"

    # Fuse f1/f2 weights & biases; pre-cast matmul weights to bf16 once.
    w12 = jnp.concatenate([params["w1"], params["w2"]], axis=1).astype(compute_dtype)
    b12 = jnp.concatenate([params["b1"], params["b2"]], axis=1).astype(jnp.float32)
    wg = params["wg"].astype(compute_dtype)
    bg = params["bg"].astype(jnp.float32)
    gamma = params["gamma"].astype(jnp.float32)
    beta = params["beta"].astype(jnp.float32)

    # Host-precomputed (C, C) same-group mask (resident constant in VMEM).
    gs = C // NUM_GROUPS
    gidx = jnp.arange(C) // gs
    mask = (gidx[:, None] == gidx[None, :]).astype(jnp.float32)

    ts = _pick_tile_s(S, tile_s)
    kernel = functools.partial(_star_block_kernel, num_groups=NUM_GROUPS,
                               tile_s=ts, hidden=Hd, compute_dtype=compute_dtype)

    return pl.pallas_call(
        kernel,
        out_shape=jax.ShapeDtypeStruct((N, S, C), x_nsc.dtype),
        grid_spec=pltpu.PrefetchScalarGridSpec(
            num_scalar_prefetch=0,
            grid=(N,),
            in_specs=[
                pl.BlockSpec((None, S, C), lambda n: (n, 0, 0)),    # x (per sample)
                pl.BlockSpec((C, 2 * Hd), lambda n: (0, 0)),        # w12 (bf16)
                pl.BlockSpec((1, 2 * Hd), lambda n: (0, 0)),        # b12
                pl.BlockSpec((Hd, C), lambda n: (0, 0)),            # wg (bf16)
                pl.BlockSpec((1, C), lambda n: (0, 0)),             # bg
                pl.BlockSpec((C, C), lambda n: (0, 0)),             # group mask
                pl.BlockSpec((1, C), lambda n: (0, 0)),             # gamma
                pl.BlockSpec((1, C), lambda n: (0, 0)),             # beta
            ],
            out_specs=pl.BlockSpec((None, S, C), lambda n: (n, 0, 0)),
            scratch_shapes=[
                pltpu.VMEM((S, C), jnp.float32),   # per-sample z scratch
                pltpu.VMEM((1, C), jnp.float32),   # per-channel sum accumulator
                pltpu.VMEM((1, C), jnp.float32),   # per-channel sum-of-squares
            ],
        ),
        compiler_params=pltpu.CompilerParams(
            dimension_semantics=("parallel",),
            vmem_limit_bytes=VMEM_LIMIT_BYTES),
    )(x_nsc, w12, b12, wg, bg, mask, gamma, beta)


def star_block_pallas_nchw(x_nchw, params, **kw):
    """NCHW convenience wrapper (layout change only; prefer channels-last end-to-end)."""
    N, C, H, W = x_nchw.shape
    x = jnp.transpose(x_nchw, (0, 2, 3, 1)).reshape(N, H * W, C)
    out = star_block_pallas(x, params, **kw)
    return jnp.transpose(out.reshape(N, H, W, C), (0, 3, 1, 2))


def star_block_reference(x_nchw, params, compute_dtype=jnp.float32):
    """Pure-JAX reference matching the PyTorch module (optionally with the same
    bf16 matmul-input rounding as the kernel)."""
    N, C, H, W = x_nchw.shape
    x = jnp.transpose(x_nchw, (0, 2, 3, 1)).reshape(N, H * W, C).astype(jnp.float32)
    xc = x.astype(compute_dtype)
    w1 = params["w1"].astype(compute_dtype)
    w2 = params["w2"].astype(compute_dtype)
    wg = params["wg"].astype(compute_dtype)
    x1 = jnp.dot(xc, w1, preferred_element_type=jnp.float32) + params["b1"]
    x2 = jnp.dot(xc, w2, preferred_element_type=jnp.float32) + params["b2"]
    y = (jnp.clip(x1, 0.0, 6.0) * x2).astype(compute_dtype)
    z = jnp.dot(y, wg, preferred_element_type=jnp.float32) + params["bg"]
    gs = C // NUM_GROUPS
    zg = z.reshape(N, H * W, NUM_GROUPS, gs)
    mean = jnp.mean(zg, axis=(1, 3), keepdims=True)
    var = jnp.mean((zg - mean) ** 2, axis=(1, 3), keepdims=True)
    zn = ((zg - mean) / jnp.sqrt(var + GN_EPS)).reshape(N, H * W, C)
    zn = zn * params["gamma"] + params["beta"]
    out = zn + x
    return jnp.transpose(out.reshape(N, H, W, C), (0, 3, 1, 2))


def init_params(key, inplanes, mlp_ratio=3):
    hidden = inplanes * mlp_ratio
    k = jax.random.split(key, 6)
    s1 = 1.0 / jnp.sqrt(inplanes)
    sg = 1.0 / jnp.sqrt(hidden)
    return {
        # weights stored as (in, out) so y = x @ W + b  (== 1x1 conv)
        "w1": jax.random.uniform(k[0], (inplanes, hidden), jnp.float32, -s1, s1),
        "b1": jax.random.uniform(k[1], (1, hidden), jnp.float32, -s1, s1),
        "w2": jax.random.uniform(k[2], (inplanes, hidden), jnp.float32, -s1, s1),
        "b2": jax.random.uniform(k[3], (1, hidden), jnp.float32, -s1, s1),
        "wg": jax.random.uniform(k[4], (hidden, inplanes), jnp.float32, -sg, sg),
        "bg": jax.random.uniform(k[5], (1, inplanes), jnp.float32, -sg, sg),
        "gamma": jnp.ones((1, inplanes), jnp.float32),   # GN init: weight=1
        "beta": jnp.zeros((1, inplanes), jnp.float32),   # GN init: bias=0
    }


if __name__ == "__main__":
    # GroupNorm(32, C) requires C % 32 == 0; C=128 keeps I/O lane-dense (128 lanes).
    N, C, H, W = 2, 128, 8, 8
    key = jax.random.PRNGKey(0)
    kx, kp = jax.random.split(key)
    x = jax.random.normal(kx, (N, C, H, W), jnp.float32)
    params = init_params(kp, C, mlp_ratio=3)

    # tile_s=32 exercises the multi-tile spatial loop at this small demo size.
    out = jax.block_until_ready(
        star_block_pallas_nchw(x, params, tile_s=32, compute_dtype=jnp.bfloat16))

    # Tight check vs a reference using the same bf16 matmul-input rounding.
    ref_matched = star_block_reference(x, params, compute_dtype=jnp.bfloat16)
    # Loose sanity check vs the full-f32 PyTorch-faithful reference.
    ref_f32 = star_block_reference(x, params, compute_dtype=jnp.float32)

    assert out.shape == (N, C, H, W)
    assert jnp.allclose(out, ref_matched, atol=5e-3, rtol=5e-3), "mismatch vs matched reference"
    assert float(jnp.max(jnp.abs(out - ref_f32))) < 0.35, "mismatch vs f32 reference"
    print("KERNEL_OK")
</pallas_src>

<mosaic_0001>
module attributes {stable_mosaic.version = 11 : i64} {
  func.func @_star_block_kernel(%arg0: i32, %arg1: memref<1x64x128xf32, #tpu.memory_space<vmem>>, %arg2: memref<128x768xbf16, #tpu.memory_space<vmem>>, %arg3: memref<1x768xf32, #tpu.memory_space<vmem>>, %arg4: memref<384x128xbf16, #tpu.memory_space<vmem>>, %arg5: memref<1x128xf32, #tpu.memory_space<vmem>>, %arg6: memref<128x128xf32, #tpu.memory_space<vmem>>, %arg7: memref<1x128xf32, #tpu.memory_space<vmem>>, %arg8: memref<1x128xf32, #tpu.memory_space<vmem>>, %arg9: memref<1x64x128xf32, #tpu.memory_space<vmem>>, %arg10: memref<64x128xf32, #tpu.memory_space<vmem>>, %arg11: memref<1x128xf32, #tpu.memory_space<vmem>>, %arg12: memref<1x128xf32, #tpu.memory_space<vmem>>) attributes {dimension_semantics = [#tpu.dimension_semantics<parallel>], iteration_bounds = array<i64: 2>, scalar_prefetch = 0 : i64, scratch_operands = 3 : i64, tpu.core_type = #tpu.core_type<tc>, window_params = [{transform_indices = @transform_0, window_bounds = array<i64: 1, 64, 128>}, {pipeline_mode = #tpu.pipeline_mode<synchronous>, transform_indices = @transform_1, window_bounds = array<i64: 128, 768>}, {pipeline_mode = #tpu.pipeline_mode<synchronous>, transform_indices = @transform_2, window_bounds = array<i64: 1, 768>}, {pipeline_mode = #tpu.pipeline_mode<synchronous>, transform_indices = @transform_3, window_bounds = array<i64: 384, 128>}, {pipeline_mode = #tpu.pipeline_mode<synchronous>, transform_indices = @transform_4, window_bounds = array<i64: 1, 128>}, {pipeline_mode = #tpu.pipeline_mode<synchronous>, transform_indices = @transform_5, window_bounds = array<i64: 128, 128>}, {pipeline_mode = #tpu.pipeline_mode<synchronous>, transform_indices = @transform_6, window_bounds = array<i64: 1, 128>}, {pipeline_mode = #tpu.pipeline_mode<synchronous>, transform_indices = @transform_7, window_bounds = array<i64: 1, 128>}, {transform_indices = @transform_8, window_bounds = array<i64: 1, 64, 128>}]} {
    %cst = arith.constant 0.000000e+00 : f32
    %0 = vector.broadcast %cst : f32 to vector<1x128xf32>
    %c0 = arith.constant 0 : index
    %c0_0 = arith.constant 0 : index
    %1 = vector.load %arg11[%c0, %c0_0] : memref<1x128xf32, #tpu.memory_space<vmem>>, vector<1x128xf32>
    tpu.vector_store %arg11[%c0, %c0_0], %0 {strides = array<i32>} : memref<1x128xf32, #tpu.memory_space<vmem>>, vector<1x128xf32>,
    %cst_1 = arith.constant 0.000000e+00 : f32
    %2 = vector.broadcast %cst_1 : f32 to vector<1x128xf32>
    %c0_2 = arith.constant 0 : index
    %c0_3 = arith.constant 0 : index
    %3 = vector.load %arg12[%c0_2, %c0_3] : memref<1x128xf32, #tpu.memory_space<vmem>>, vector<1x128xf32>
    tpu.vector_store %arg12[%c0_2, %c0_3], %2 {strides = array<i32>} : memref<1x128xf32, #tpu.memory_space<vmem>>, vector<1x128xf32>,
    %cst_4 = arith.constant 1.000000e+00 : f32
    %4 = vector.broadcast %cst_4 : f32 to vector<1x32xf32>
    %c0_i32 = arith.constant 0 : i32
    %c2_i32 = arith.constant 2 : i32
    %5 = arith.addi %c0_i32, %c2_i32 : i32
    %c1_i32 = arith.constant 1 : i32
    scf.for %arg13 = %c0_i32 to %5 step %c1_i32  : i32 {
      %c1_i32_28 = arith.constant 1 : i32
      %29 = arith.muli %arg13, %c1_i32_28 : i32
      %c0_i32_29 = arith.constant 0 : i32
      %30 = arith.addi %c0_i32_29, %29 : i32
      %c32_i32 = arith.constant 32 : i32
      %31 = arith.muli %30, %c32_i32 : i32
      %32 = tpu.assume_multiple %31, 32 : i32
      %c0_30 = arith.constant 0 : index
      %33 = arith.index_cast %32 : i32 to index
      %c0_31 = arith.constant 0 : index
      %34 = vector.load %arg1[%c0_30, %33, %c0_31] : memref<1x64x128xf32, #tpu.memory_space<vmem>>, vector<1x32x128xf32>
      %35 = vector.shape_cast %34 : vector<1x32x128xf32> to vector<32x128xf32>
      %36 = arith.truncf %35 : vector<32x128xf32> to vector<32x128xbf16>
      %c0_32 = arith.constant 0 : index
      %c0_33 = arith.constant 0 : index
      %37 = vector.load %arg2[%c0_32, %c0_33] : memref<128x768xbf16, #tpu.memory_space<vmem>>, vector<128x768xbf16>
      %cst_34 = arith.constant dense<0.000000e+00> : vector<32x768xf32>
      %38 = tpu.matmul %36, %37, %cst_34 {dimension_numbers = #tpu.dot_dimension_numbers<[1], [0], [0], [1], [0, 0, 1, 1], [], []>} : vector<32x128xbf16>, vector<128x768xbf16>, vector<32x768xf32> -> vector<32x768xf32>
      %c0_35 = arith.constant 0 : index
      %c0_36 = arith.constant 0 : index
      %39 = vector.load %arg3[%c0_35, %c0_36] : memref<1x768xf32, #tpu.memory_space<vmem>>, vector<1x768xf32>
      %40 = vector.broadcast %39 : vector<1x768xf32> to vector<32x768xf32>
      %41 = arith.addf %38, %40 : vector<32x768xf32>
      %42 = vector.extract_strided_slice %41 {offsets = [0, 0], sizes = [32, 384], strides = [1, 1]} : vector<32x768xf32> to vector<32x384xf32>
      %43 = vector.extract_strided_slice %41 {offsets = [0, 384], sizes = [32, 384], strides = [1, 1]} : vector<32x768xf32> to vector<32x384xf32>
      %cst_37 = arith.constant 0.000000e+00 : f32
      %cst_38 = arith.constant 6.000000e+00 : f32
      %44 = vector.broadcast %cst_37 : f32 to vector<32x384xf32>
      %45 = arith.maximumf %44, %42 : vector<32x384xf32>
      %46 = vector.broadcast %cst_38 : f32 to vector<32x384xf32>
      %47 = arith.minimumf %46, %45 : vector<32x384xf32>
      %48 = arith.mulf %47, %43 : vector<32x384xf32>
      %49 = arith.truncf %48 : vector<32x384xf32> to vector<32x384xbf16>
      %c0_39 = arith.constant 0 : index
      %c0_40 = arith.constant 0 : index
      %50 = vector.load %arg4[%c0_39, %c0_40] : memref<384x128xbf16, #tpu.memory_space<vmem>>, vector<384x128xbf16>
      %cst_41 = arith.constant dense<0.000000e+00> : vector<32x128xf32>
      %51 = tpu.matmul %49, %50, %cst_41 {dimension_numbers = #tpu.dot_dimension_numbers<[1], [0], [0], [1], [0, 0, 1, 1], [], []>} : vector<32x384xbf16>, vector<384x128xbf16>, vector<32x128xf32> -> vector<32x128xf32>
      %c0_42 = arith.constant 0 : index
      %c0_43 = arith.constant 0 : index
      %52 = vector.load %arg5[%c0_42, %c0_43] : memref<1x128xf32, #tpu.memory_space<vmem>>, vector<1x128xf32>
      %53 = vector.broadcast %52 : vector<1x128xf32> to vector<32x128xf32>
      %54 = arith.addf %51, %53 : vector<32x128xf32>
      %55 = arith.index_cast %32 : i32 to index
      %c0_44 = arith.constant 0 : index
      %56 = vector.load %arg10[%55, %c0_44] : memref<64x128xf32, #tpu.memory_space<vmem>>, vector<32x128xf32>
      tpu.vector_store %arg10[%55, %c0_44], %54 {strides = array<i32>} : memref<64x128xf32, #tpu.memory_space<vmem>>, vector<32x128xf32>,
      %c0_45 = arith.constant 0 : index
      %c0_46 = arith.constant 0 : index
      %57 = vector.load %arg11[%c0_45, %c0_46] : memref<1x128xf32, #tpu.memory_space<vmem>>, vector<1x128xf32>
      %cst_47 = arith.constant dense<0.000000e+00> : vector<1x128xf32>
      %58 = tpu.matmul %4, %54, %cst_47 {dimension_numbers = #tpu.dot_dimension_numbers<[1], [0], [0], [1], [0, 0, 1, 1], [], []>} : vector<1x32xf32>, vector<32x128xf32>, vector<1x128xf32> -> vector<1x128xf32>
      %59 = arith.addf %57, %58 : vector<1x128xf32>
      %c0_48 = arith.constant 0 : index
      %c0_49 = arith.constant 0 : index
      %60 = vector.load %arg11[%c0_48, %c0_49] : memref<1x128xf32, #tpu.memory_space<vmem>>, vector<1x128xf32>
      tpu.vector_store %arg11[%c0_48, %c0_49], %59 {strides = array<i32>} : memref<1x128xf32, #tpu.memory_space<vmem>>, vector<1x128xf32>,
      %c0_50 = arith.constant 0 : index
      %c0_51 = arith.constant 0 : index
      %61 = vector.load %arg12[%c0_50, %c0_51] : memref<1x128xf32, #tpu.memory_space<vmem>>, vector<1x128xf32>
      %62 = arith.mulf %54, %54 : vector<32x128xf32>
      %cst_52 = arith.constant dense<0.000000e+00> : vector<1x128xf32>
      %63 = tpu.matmul %4, %62, %cst_52 {dimension_numbers = #tpu.dot_dimension_numbers<[1], [0], [0], [1], [0, 0, 1, 1], [], []>} : vector<1x32xf32>, vector<32x128xf32>, vector<1x128xf32> -> vector<1x128xf32>
      %64 = arith.addf %61, %63 : vector<1x128xf32>
      %c0_53 = arith.constant 0 : index
      %c0_54 = arith.constant 0 : index
      %65 = vector.load %arg12[%c0_53, %c0_54] : memref<1x128xf32, #tpu.memory_space<vmem>>, vector<1x128xf32>
      tpu.vector_store %arg12[%c0_53, %c0_54], %64 {strides = array<i32>} : memref<1x128xf32, #tpu.memory_space<vmem>>, vector<1x128xf32>,
    }
    %c2_i32_5 = arith.constant 2 : i32
    %c0_6 = arith.constant 0 : index
    %c0_7 = arith.constant 0 : index
    %6 = vector.load %arg11[%c0_6, %c0_7] : memref<1x128xf32, #tpu.memory_space<vmem>>, vector<1x128xf32>
    %c0_8 = arith.constant 0 : index
    %c0_9 = arith.constant 0 : index
    %7 = vector.load %arg6[%c0_8, %c0_9] : memref<128x128xf32, #tpu.memory_space<vmem>>, vector<128x128xf32>
    %cst_10 = arith.constant dense<0.000000e+00> : vector<1x128xf32>
    %8 = tpu.matmul %6, %7, %cst_10 {dimension_numbers = #tpu.dot_dimension_numbers<[1], [0], [0], [1], [0, 0, 1, 1], [], []>} : vector<1x128xf32>, vector<128x128xf32>, vector<1x128xf32> -> vector<1x128xf32>
    %c0_11 = arith.constant 0 : index
    %c0_12 = arith.constant 0 : index
    %9 = vector.load %arg12[%c0_11, %c0_12] : memref<1x128xf32, #tpu.memory_space<vmem>>, vector<1x128xf32>
    %c0_13 = arith.constant 0 : index
    %c0_14 = arith.constant 0 : index
    %10 = vector.load %arg6[%c0_13, %c0_14] : memref<128x128xf32, #tpu.memory_space<vmem>>, vector<128x128xf32>
    %cst_15 = arith.constant dense<0.000000e+00> : vector<1x128xf32>
    %11 = tpu.matmul %9, %10, %cst_15 {dimension_numbers = #tpu.dot_dimension_numbers<[1], [0], [0], [1], [0, 0, 1, 1], [], []>} : vector<1x128xf32>, vector<128x128xf32>, vector<1x128xf32> -> vector<1x128xf32>
    %cst_16 = arith.constant 2.560000e+02 : f32
    %12 = vector.broadcast %cst_16 : f32 to vector<1x128xf32>
    %13 = arith.divf %8, %12 : vector<1x128xf32>
    %cst_17 = arith.constant 2.560000e+02 : f32
    %14 = vector.broadcast %cst_17 : f32 to vector<1x128xf32>
    %15 = arith.divf %11, %14 : vector<1x128xf32>
    %16 = arith.mulf %13, %13 : vector<1x128xf32>
    %17 = arith.subf %15, %16 : vector<1x128xf32>
    %cst_18 = arith.constant 0.000000e+00 : f32
    %18 = vector.broadcast %cst_18 : f32 to vector<1x128xf32>
    %19 = arith.maximumf %17, %18 : vector<1x128xf32>
    %cst_19 = arith.constant 9.99999974E-6 : f32
    %20 = vector.broadcast %cst_19 : f32 to vector<1x128xf32>
    %21 = arith.addf %19, %20 : vector<1x128xf32>
    %22 = math.rsqrt %21 : vector<1x128xf32>
    %c0_20 = arith.constant 0 : index
    %c0_21 = arith.constant 0 : index
    %23 = vector.load %arg7[%c0_20, %c0_21] : memref<1x128xf32, #tpu.memory_space<vmem>>, vector<1x128xf32>
    %24 = arith.mulf %22, %23 : vector<1x128xf32>
    %c0_22 = arith.constant 0 : index
    %c0_23 = arith.constant 0 : index
    %25 = vector.load %arg8[%c0_22, %c0_23] : memref<1x128xf32, #tpu.memory_space<vmem>>, vector<1x128xf32>
    %26 = arith.mulf %13, %24 : vector<1x128xf32>
    %27 = arith.subf %25, %26 : vector<1x128xf32>
    %c0_i32_24 = arith.constant 0 : i32
    %c2_i32_25 = arith.constant 2 : i32
    %28 = arith.addi %c0_i32_24, %c2_i32_25 : i32
    %c1_i32_26 = arith.constant 1 : i32
    scf.for %arg13 = %c0_i32_24 to %28 step %c1_i32_26  : i32 {
      %c1_i32_28 = arith.constant 1 : i32
      %29 = arith.muli %arg13, %c1_i32_28 : i32
      %c0_i32_29 = arith.constant 0 : i32
      %30 = arith.addi %c0_i32_29, %29 : i32
      %c32_i32 = arith.constant 32 : i32
      %31 = arith.muli %30, %c32_i32 : i32
      %32 = tpu.assume_multiple %31, 32 : i32
      %33 = arith.index_cast %32 : i32 to index
      %c0_30 = arith.constant 0 : index
      %34 = vector.load %arg10[%33, %c0_30] : memref<64x128xf32, #tpu.memory_space<vmem>>, vector<32x128xf32>
      %c0_31 = arith.constant 0 : index
      %35 = arith.index_cast %32 : i32 to index
      %c0_32 = arith.constant 0 : index
      %36 = vector.load %arg1[%c0_31, %35, %c0_32] : memref<1x64x128xf32, #tpu.memory_space<vmem>>, vector<1x32x128xf32>
      %37 = vector.shape_cast %36 : vector<1x32x128xf32> to vector<32x128xf32>
      %38 = vector.broadcast %24 : vector<1x128xf32> to vector<32x128xf32>
      %39 = arith.mulf %34, %38 : vector<32x128xf32>
      %40 = vector.broadcast %27 : vector<1x128xf32> to vector<32x128xf32>
      %41 = arith.addf %39, %40 : vector<32x128xf32>
      %42 = arith.addf %41, %37 : vector<32x128xf32>
      %c0_33 = arith.constant 0 : index
      %43 = arith.index_cast %32 : i32 to index
      %c0_34 = arith.constant 0 : index
      %44 = vector.load %arg9[%c0_33, %43, %c0_34] : memref<1x64x128xf32, #tpu.memory_space<vmem>>, vector<1x32x128xf32>
      %45 = vector.shape_cast %44 : vector<1x32x128xf32> to vector<32x128xf32>
      %46 = vector.shape_cast %42 : vector<32x128xf32> to vector<1x32x128xf32>
      tpu.vector_store %arg9[%c0_33, %43, %c0_34], %46 {strides = array<i32>} : memref<1x64x128xf32, #tpu.memory_space<vmem>>, vector<1x32x128xf32>,
    }
    %c2_i32_27 = arith.constant 2 : i32
    return
  }
  func.func @transform_0(%arg0: i32) -> (i32, i32, i32) {
    %c0_i32 = arith.constant 0 : i32
    %c0_i32_0 = arith.constant 0 : i32
    %c0_i32_1 = arith.constant 0 : i32
    return %arg0, %c0_i32, %c0_i32_0 : i32, i32, i32
  }
  func.func @transform_1(%arg0: i32) -> (i32, i32) {
    %c0_i32 = arith.constant 0 : i32
    %c0_i32_0 = arith.constant 0 : i32
    %c0_i32_1 = arith.constant 0 : i32
    return %c0_i32, %c0_i32_0 : i32, i32
  }
  func.func @transform_2(%arg0: i32) -> (i32, i32) {
    %c0_i32 = arith.constant 0 : i32
    %c0_i32_0 = arith.constant 0 : i32
    %c0_i32_1 = arith.constant 0 : i32
    return %c0_i32, %c0_i32_0 : i32, i32
  }
  func.func @transform_3(%arg0: i32) -> (i32, i32) {
    %c0_i32 = arith.constant 0 : i32
    %c0_i32_0 = arith.constant 0 : i32
    %c0_i32_1 = arith.constant 0 : i32
    return %c0_i32, %c0_i32_0 : i32, i32
  }
  func.func @transform_4(%arg0: i32) -> (i32, i32) {
    %c0_i32 = arith.constant 0 : i32
    %c0_i32_0 = arith.constant 0 : i32
    %c0_i32_1 = arith.constant 0 : i32
    return %c0_i32, %c0_i32_0 : i32, i32
  }
  func.func @transform_5(%arg0: i32) -> (i32, i32) {
    %c0_i32 = arith.constant 0 : i32
    %c0_i32_0 = arith.constant 0 : i32
    %c0_i32_1 = arith.constant 0 : i32
    return %c0_i32, %c0_i32_0 : i32, i32
  }
  func.func @transform_6(%arg0: i32) -> (i32, i32) {
    %c0_i32 = arith.constant 0 : i32
    %c0_i32_0 = arith.constant 0 : i32
    %c0_i32_1 = arith.constant 0 : i32
    return %c0_i32, %c0_i32_0 : i32, i32
  }
  func.func @transform_7(%arg0: i32) -> (i32, i32) {
    %c0_i32 = arith.constant 0 : i32
    %c0_i32_0 = arith.constant 0 : i32
    %c0_i32_1 = arith.constant 0 : i32
    return %c0_i32, %c0_i32_0 : i32, i32
  }
  func.func @transform_8(%arg0: i32) -> (i32, i32, i32) {
    %c0_i32 = arith.constant 0 : i32
    %c0_i32_0 = arith.constant 0 : i32
    %c0_i32_1 = arith.constant 0 : i32
    return %arg0, %c0_i32, %c0_i32_0 : i32, i32, i32
  }
}

</mosaic_0001>

<bundles_post_ra>
// kernel: tpu_custom_call.1
= control target key start
LH: loop header
LB: loop body
LE: loop exit
PB: predicated region body
PF: predicated region fallthrough
CT: control target
= control target key end

     0   :  { %s2835_s0 = inlined_call_operand.hbm [shape: f32[2,64,128], index: 0, kind: input, shape index: {}]   ;;  %s2836_s1 = inlined_call_operand.hbm [shape: bf16[128,768], index: 1, kind: input, shape index: {}]   ;;  %s2837_s2 = inlined_call_operand.hbm [shape: f32[1,768], index: 2, kind: input, shape index: {}]   ;;  %s2838_s3 = inlined_call_operand.hbm [shape: bf16[384,128], index: 3, kind: input, shape index: {}]   ;;  %s2839_s4 = inlined_call_operand.vmem [shape: f32[1,128], index: 4, kind: input, shape index: {}]   ;;  %s2840_s5 = inlined_call_operand.hbm [shape: f32[128,128], index: 5, kind: input, shape index: {}]   ;;  %s2841_s6 = inlined_call_operand.vmem [shape: f32[1,128], index: 6, kind: input, shape index: {}]   ;;  %s2842_s7 = inlined_call_operand.vmem [shape: f32[1,128], index: 7, kind: input, shape index: {}]   ;;  %s2843_s8 = inlined_call_operand.hbm [shape: f32[2,64,128], index: 8, kind: output, shape index: {}]  }
   0x1   :  { %2850 = sst [smem:[#allocation19_spill]] %s2836_s1 }
   0x2   :  { %2851 = sst [smem:[#allocation20_spill]] %s2837_s2 }
   0x3   :  { %13 = vsyncpa [#allocation6], 0 }
   0x4   :  { %15 = vsyncpa [#allocation6 + $0x1], 0 }
   0x5   :  { %16 = vsyncpa [#allocation9], 0 }
   0x6   :  { %17 = vsyncpa [#allocation12], 0 }
   0x7   :  { %18 = vsyncpa [#allocation7], 0 }
   0x8   :  { %20 = vsyncpa [#allocation7 + $0x1], 0  ;;  %s2531_s27 = smov 0   ;;  %s2533_s28 = smov 0  }
   0x9   :  { %s2535_s29 = smov 0   ;;  %s2537_s30 = smov 0  }
   0xa LB: > { %s2552_s9 = sadd.s32 4294967295, %s2456_s30   ;;  %s1734_s10 = sadd.s32 4294967294, %s2456_s30   ;;  %s2456_s30 = sphi %s2537_s30, %s2875_s30   ;;  %s2452_s29 = sphi %s2535_s29, %s2874_s29   ;;  %s2448_s28 = sphi %s2533_s28, %s2873_s28   ;;  %s2444_s27 = sphi %s2531_s27, %s2872_s27  }
   0xb   : > { %p46_p0 = scmp.ne.s32.totalorder %s2448_s28, %s2444_s27  ;;  %p2844_p1 = scmp.eq.s32.totalorder %s2552_s9, 0 }
   0xc   : > { %p223_p3 = scmp.eq.s32.totalorder %s1734_s10, 1  ;;  %p1735_p5 = scmp.ge.s32.totalorder %s2456_s30, 1 }
   0xd   : > { %p2561_p4 = por %p2844_p1, %p46_p0  ;;  %p230_p7 = scmp.lt.s32.totalorder %s2456_s30, 3 }
   0xe   : > { %p2566_p6 = por %p223_p3, %p46_p0  ;;  %s2466_s14 = smov [#allocation8]  }
   0xf   : > { %s2852_s11 = scalar_select %p2561_p4, 1, 0 }
  0x10   : > { %s2853_s12 = scalar_select %p2566_p6, 1, 0 }
  0x11   : > { %p2571_p8 = pnand %p1735_p5, %p230_p7  ;;  %s242_s15 = sshll.u32 %s2466_s14, 4  ;;  %s243_s15 = int_to_ptr.vmem [resolvable:$true] %s242_s15 }
  0x12   : > { %s2467_s17 = smov [#allocation11]   ;;  %s2255_s19 = scalar_lea.vmem %s243_s15, 6144 }
  0x13   : > { %s2854_s13 = scalar_select %p2571_p8, 1, 0 }
  0x14   : > { %p2049_p9 = pneg %p2571_p8  ;;  %s266_s18 = sshll.u32 %s2467_s17, 4  ;;  %s267_s18 = int_to_ptr.vmem [resolvable:$true] %s266_s18 }
  0x15   : > { %p2256_p13 = scmp.ne.s32.totalorder %s243_s15, %s2255_s19  ;;  %p2263_p5 = scmp.lt.s32.totalorder %s243_s15, %s243_s15 }
  0x16   : > { %p2580_p11 = pnand %p2049_p9, %p2844_p1  ;;  %p2264_p7 = scmp.lt.s32.totalorder %s2255_s19, %s2255_s19 }
  0x18   : > { %p2246_p12 = pneg %p2580_p11  ;;  %p2265_p10 = por %p2264_p7, %p2263_p5 }
  0x1a   : > { %p2258_p0 = pnand %p2256_p13, %p2246_p12 }
  0x1c   : > { %p2259_p3 = pneg %p2258_p0 }
  0x1e   : > { %p2266_p9 = pnand %p2265_p10, %p2259_p3 }
  0x20   : > { %2269 = shalt.err (!%p2266_p9)
}
  0x21   : > { %s2468_s20 = smov 384   ;;  %s2469_s21 = smov 24  }
  0x22   : > { %s2856_s1 = sld [smem:[#allocation19_spill]]  ;;  %s2281_s24 = scalar_lea.vmem %s267_s18, 3072 }
  0x23   : > { %p2282_p1 = scmp.ne.s32.totalorder %s267_s18, %s2281_s24  ;;  %p2289_p2 = scmp.lt.s32.totalorder %s267_s18, %s267_s18 }
  0x24   : > { %p2290_p6 = scmp.lt.s32.totalorder %s2281_s24, %s2281_s24 }
  0x25   : > { %p2284_p13 = pnand %p2282_p1, %p2246_p12 }
  0x26   : > { %p2291_p5 = por %p2290_p6, %p2289_p2 }
  0x27   : > { %p2285_p0 = pneg %p2284_p13 }
  0x28   : > { %2052 = dma.hbm_to_vmem [thread:$0]  (!%p2580_p11), %s2856_s1, 6144, %s243_s15, [#allocation9], %s2468_s20, %s2468_s20, %s2469_s21  }
  0x29   : > { %p2292_p10 = pnand %p2291_p5, %p2285_p0 }
  0x2b   : > { %2295 = shalt.err (!%p2292_p10)
}
  0x2c   : > { %s2470_s25 = smov 64   ;;  %s2471_s26 = smov 4  }
  0x2d   : > { %2058 = dma.hbm_to_vmem [thread:$0]  (!%p2580_p11), %s2838_s3, 3072, %s267_s18, [#allocation12], %s2470_s25, %s2470_s25, %s2471_s26  }
  0x2e   : > { %s2472_s15 = smov [#allocation10]   ;;  %s2473_s19 = smov [#allocation13]  }
  0x2f   : > { %s256_s17 = sshll.u32 %s2472_s15, 4  ;;  %s282_s20 = sshll.u32 %s2473_s19, 4  ;;  %s257_s17 = int_to_ptr.vmem [resolvable:$true] %s256_s17  ;;  %s283_s20 = int_to_ptr.vmem [resolvable:$true] %s282_s20 }
  0x30   : > { %s2307_s21 = scalar_lea.vmem %s257_s17, 96  ;;  %p2315_p3 = scmp.lt.s32.totalorder %s257_s17, %s257_s17 }
  0x31   : > { %p2308_p1 = scmp.ne.s32.totalorder %s257_s17, %s2307_s21  ;;  %p2316_p7 = scmp.lt.s32.totalorder %s2307_s21, %s2307_s21 }
  0x33   : > { %p2310_p2 = pnand %p2308_p1, %p2246_p12  ;;  %p2317_p9 = por %p2316_p7, %p2315_p3 }
  0x35   : > { %p2311_p6 = pneg %p2310_p2 }
  0x37   : > { %p2318_p13 = pnand %p2317_p9, %p2311_p6 }
  0x39   : > { %2321 = shalt.err (!%p2318_p13)
}
  0x3a   : > { %s2857_s2 = sld [smem:[#allocation20_spill]]  ;;  %s2333_s23 = scalar_lea.vmem %s283_s20, 2048 }
  0x3b   : > { %p2334_p0 = scmp.ne.s32.totalorder %s283_s20, %s2333_s23  ;;  %p2341_p1 = scmp.lt.s32.totalorder %s283_s20, %s283_s20 }
  0x3c   : > { %p2342_p2 = scmp.lt.s32.totalorder %s2333_s23, %s2333_s23 }
  0x3d   : > { %p2336_p5 = pnand %p2334_p0, %p2246_p12 }
  0x3e   : > { %p2343_p4 = por %p2342_p2, %p2341_p1 }
  0x3f   : > { %p2337_p10 = pneg %p2336_p5 }
  0x40   : > { %2055 = dma.hbm_to_vmem [thread:$0]  (!%p2580_p11), %s2857_s2, 96, %s257_s17, [#allocation9]  }
  0x41   : > { %p2344_p8 = pnand %p2343_p4, %p2337_p10 }
  0x43   : > { %2347 = shalt.err (!%p2344_p8)
}
  0x44   : > { %s2847_s24 = smov 128   ;;  %s2848_s25 = smov 8  }
  0x45   : > { %2061 = dma.hbm_to_vmem [thread:$0]  (!%p2580_p11), %s2840_s5, 2048, %s283_s20, [#allocation12], %s2847_s24, %s2847_s24, %s2848_s25  }
  0x46   : > { %s2622_s14 = sadd.s32 1, %s2456_s30   ;;  %s33_s17 = sadd.s32 1, %s2452_s29 }
  0x47   : > { %s30_s15 = ssub.s32 %s2456_s30, %s2622_s14  ;;  %p40_p8 = scmp.ne.s32.totalorder %s2452_s29, %s2448_s28 }
  0x48   : > { %p31_p4 = scmp.eq.s32.totalorder %s30_s15, 0  ;;  %p41_p12 = scmp.eq.s32.totalorder %s2456_s30, 0 }
  0x49   : > { %p2858_p3 = scmp.eq.s32.totalorder %s2552_s9, 1  ;;  %p2074_p9 = scmp.lt.s32.totalorder %s2456_s30, 2 }
  0x4a   : > { %s2631_s19 = scalar_select %p31_p4, %s2452_s29, %s33_s17  }
  0x4b   : > { %p42_p6 = por %p41_p12, %p40_p8  ;;  %p2635_p7 = por %p2858_p3, %p40_p8 }
  0x4c   : > { %s302_s21 = sand.u32 1, %s2452_s29   ;;  %s1833_s20 = sshll.u32 %s2456_s30, 10 }
  0x4d   : > { %s2859_s16 = scalar_select %p2635_p7, 1, 0 }
  0x4e   : > { %s1741_s18 = sshll.u32 %s302_s21, 6  ;;  %s2645_s26 = scalar_lea.hbm %s2835_s0, %s1833_s20 }
  0x4f   : > { %s306_s10 = scalar_lea.vmem [#allocation5], %s1741_s18  ;;  %p2649_p11 = pnand %p2074_p9, %p42_p6 }
  0x50   : > { %s313_s15 = sshll.u32 %s306_s10, 4  ;;  %s2653_s24 = scalar_lea.sflag [#allocation6], %s302_s21  ;;  %s2647_s15 = int_to_ptr.vmem [resolvable:$true] %s313_s15 }
  0x51   : > { %s2348_s25 = scalar_lea.hbm %s2645_s26, 1024  ;;  %p2350_p0 = pneg %p2649_p11 }
  0x52   : > { %p2349_p13 = scmp.ne.s32.totalorder %s2645_s26, %s2348_s25  ;;  %s2353_s18 = scalar_lea.hbm %s2835_s0, 2048 }
  0x53   : > { %p2354_p1 = scmp.lt.s32.totalorder %s2645_s26, %s2835_s0  ;;  %p2355_p2 = scmp.lt.s32.totalorder %s2353_s18, %s2348_s25 }
  0x54   : > { %p2351_p5 = pnand %p2350_p0, %p2349_p13 }
  0x55   : > { %p2356_p4 = por %p2355_p2, %p2354_p1 }
  0x56   : > { %p2352_p10 = pneg %p2351_p5 }
  0x58   : > { %p2357_p8 = pnand %p2356_p4, %p2352_p10 }
  0x5a   : > { %2360 = shalt.err (!%p2357_p8)
}
  0x5b   : > { %s2361_s21 = scalar_lea.vmem %s2647_s15, 1024  ;;  %s2476_s1 = smov [#allocation5]  }
  0x5c   : > { %p2362_p12 = scmp.ne.s32.totalorder %s2647_s15, %s2361_s21  ;;  %s2366_s2 = sshll.u32 %s2476_s1, 4  ;;  %s2367_s2 = int_to_ptr.vmem [resolvable:$false] %s2366_s2 }
  0x5d   : > { %s2368_s20 = scalar_lea.vmem %s2367_s2, 2048  ;;  %p2369_p9 = scmp.lt.s32.totalorder %s2647_s15, %s2367_s2 }
  0x5e   : > { %p2364_p6 = pnand %p2362_p12, %p2350_p0  ;;  %p2370_p13 = scmp.lt.s32.totalorder %s2368_s20, %s2361_s21 }
  0x60   : > { %p2365_p3 = pneg %p2364_p6  ;;  %p2371_p5 = por %p2370_p13, %p2369_p9 }
  0x62   : > { %p2372_p7 = pnand %p2371_p5, %p2365_p3 }
  0x64   : > { %2375 = shalt.err (!%p2372_p7)
}
  0x65   : > { %s2861_s25 = smov 8   ;;  %s2862_s22 = smov 128  }
  0x66   : > { %2065 = dma.hbm_to_vmem [thread:$0]  (!%p2649_p11), %s2645_s26, 1024, %s2647_s15, %s2653_s24, %s2862_s22, %s2862_s22, %s2861_s25  }
  0x67   : > { %p2863_p0 = scmp.ne.s32.totalorder %s2854_s13, 0 }
  0x68   : > { %s2680_s1 = sand.u32 (!%p2863_p0), 1, %s2448_s28   ;;  %p2864_p7 = scmp.ne.s32.totalorder (!%p2863_p0), %s2852_s11, 0 }
  0x69   : > { %325 = sbr.rel (%p2863_p0) target bundleno = 1071 (0x42f), region = 52  ;;  %s1745_s2 = sshll.u32 (!%p2863_p0), %s2680_s1, 6 }
  0x6a   : > { %s328_s18 = scalar_lea.sflag (!%p2863_p0), [#allocation6], %s2680_s1  ;;  %s2684_s23 = scalar_lea.vmem (!%p2863_p0), [#allocation5], %s1745_s2 }
  0x6e   : > { %2427 = dma.done.wait (%p2864_p7), %s328_s18, 1024  }
  0x6f   : > { %2429 = vsyncadd (%p2864_p7), %s328_s18, 4294966272  ;;  %p2865_p11 = scmp.eq.s32.totalorder %s2552_s9, 0 }
  0x71   : > { %2431 = dma.done.wait (%p2865_p11), [#allocation9], 6240   ;;  %p2866_p10 = pmov %p2865_p11 }
  0x73   : > { %2433 = vsyncadd (%p2866_p10), [#allocation9], 4294961056  ;;  %p2867_p1 = pmov %p2866_p10 }
  0x75   : > { %2435 = dma.done.wait (%p2867_p1), [#allocation12], 5120   ;;  %p2868_p2 = pmov %p2867_p1 }
  0x76   : > { %v2477_v0 = vmov 0.0   ;;  %s2700_s13 = scalar_lea.vmem [#allocation14], %s1745_s2  ;;  %s2702_s11 = smov 0  }
  0x77   : > { %2437 = vsyncadd (%p2868_p2), [#allocation12], 4294962176  ;;  %381 = vst [vmem:[#allocation3] sm:$0x1] %v2477_v0 }
  0x78   : > { %382 = vst [vmem:[#allocation4] sm:$0x1] %v2477_v0 }
  0x79 LB: >> { %v2146_v1 = vld [vmem:[#allocation8 + $0x154] ss:$24 sps:$4 sm:$0xff]   ;;  %v2148_v2 = vld [vmem:[#allocation8 + $0x150] ss:$24 sps:$4 sm:$0xff]   ;;  %v2478_v3 = vmov 0   ;;  %s1751_s24 = sshll.u32 %s2460_s11, 5  ;;  %s2460_s11 = sphi %s2702_s11, %s388_s11  }
  0x7a   : >> { %749 = vmatprep.mubr.bf16.mxu0 %v2478_v3  ;;  %802 = vmatprep.mubr.bf16.mxu1 %v2478_v3  ;;  %v2149_v4 = vld [vmem:[#allocation8 + $0x15c] ss:$24 sps:$4 sm:$0xff]   ;;  %v2151_v5 = vld [vmem:[#allocation8 + $0x158] ss:$24 sps:$4 sm:$0xff]   ;;  %v2155_v8 = vld [vmem:[#allocation8 + $0x12c] ss:$24 sps:$4 sm:$0xff]   ;;  %s390_s26 = scalar_lea.vmem %s2684_s23, %s1751_s24 [#allocation5] }
  0x7b   : >> { %717 = vmatprep.subr.bf16.mxu0 %v2146_v1  ;;  %v2152_v6 = vld [vmem:[#allocation8 + $0x124] ss:$24 sps:$4 sm:$0xff]   ;;  %v2154_v7 = vld [vmem:[#allocation8 + $0x120] ss:$24 sps:$4 sm:$0xff]   ;;  %770 = vmatprep.subr.bf16.mxu1 %v2149_v4  ;;  %v2158_v10 = vld [vmem:[#allocation8 + $0xf4] ss:$24 sps:$4 sm:$0xff]  }
  0x7c   : >> { %718 = vmatpush1.bf16.msra.mxu0 %v2148_v2  ;;  %771 = vmatpush1.bf16.msra.mxu1 %v2151_v5  ;;  %v2157_v9 = vld [vmem:[#allocation8 + $0x128] ss:$24 sps:$4 sm:$0xff]   ;;  %v2161_v12 = vld [vmem:[#allocation8 + $0xfc] ss:$24 sps:$4 sm:$0xff]   ;;  %v2163_v14 = vld [vmem:[#allocation8 + $0xf8] ss:$24 sps:$4 sm:$0xff]  }
  0x7d   : >> { %719 = vmatprep.subr.bf16.mxu0 %v2152_v6  ;;  %772 = vmatprep.subr.bf16.mxu1 %v2155_v8  ;;  %v2160_v11 = vld [vmem:[#allocation8 + $0xf0] ss:$24 sps:$4 sm:$0xff]   ;;  %v2164_v13 = vld [vmem:[#allocation8 + $0xc4] ss:$24 sps:$4 sm:$0xff]   ;;  %v2166_v16 = vld [vmem:[#allocation8 + $0xc0] ss:$24 sps:$4 sm:$0xff]  }
  0x7e   : >> { %v2167_v15 = vld [vmem:[#allocation8 + $0xcc] ss:$24 sps:$4 sm:$0xff]   ;;  %v2169_v18 = vld [vmem:[#allocation8 + $0xc8] ss:$24 sps:$4 sm:$0xff]   ;;  %v2173_v19 = vld [vmem:[#allocation8 + $0x9c] ss:$24 sps:$4 sm:$0xff]  }
  0x7f   : >> { %v2170_v17 = vld [vmem:[#allocation8 + $0x94] ss:$24 sps:$4 sm:$0xff]   ;;  %v2172_v20 = vld [vmem:[#allocation8 + $0x90] ss:$24 sps:$4 sm:$0xff]   ;;  %v2176_v21 = vld [vmem:[#allocation8 + $0x64] ss:$24 sps:$4 sm:$0xff]  }
  0x80   : >> { %720 = vmatpush1.bf16.msra.mxu0 %v2154_v7  ;;  %773 = vmatpush1.bf16.msra.mxu1 %v2157_v9  ;;  %v2175_v22 = vld [vmem:[#allocation8 + $0x98] ss:$24 sps:$4 sm:$0xff]   ;;  %v2179_v23 = vld [vmem:[#allocation8 + $0x6c] ss:$24 sps:$4 sm:$0xff]   ;;  %v2181_v26 = vld [vmem:[#allocation8 + $0x68] ss:$24 sps:$4 sm:$0xff]  }
  0x81   : >> { %721 = vmatprep.subr.bf16.mxu0 %v2158_v10  ;;  %774 = vmatprep.subr.bf16.mxu1 %v2161_v12  ;;  %v2178_v24 = vld [vmem:[#allocation8 + $0x60] ss:$24 sps:$4 sm:$0xff]   ;;  %v2182_v25 = vld [vmem:[#allocation8 + $0x34] ss:$24 sps:$4 sm:$0xff]   ;;  %v2184_v28 = vld [vmem:[#allocation8 + $0x30] ss:$24 sps:$4 sm:$0xff]  }
  0x82   : >> { %v2185_v27 = vld [vmem:[#allocation8 + $0x3c] ss:$24 sps:$4 sm:$0xff]   ;;  %v2187_v29 = vld [vmem:[#allocation8 + $0x38] ss:$24 sps:$4 sm:$0xff]   ;;  %v2191_v32 = vld [vmem:[#allocation8 + $0xc] ss:$24 sps:$4 sm:$0xff]  }
  0x83   : >> { %v2188_v30 = vld [vmem:[#allocation8 + $0x4] ss:$24 sps:$4 sm:$0xff]   ;;  %v2190_v31 = vld [vmem:[#allocation8] ss:$24 sps:$4 sm:$0xff]   ;;  %v2199_v39 = vld [vmem:[#allocation8 + $0x134] ss:$24 sps:$4 sm:$0xff]  }
  0x84   : >> { %722 = vmatpush1.bf16.msra.mxu0 %v2160_v11  ;;  %775 = vmatpush1.bf16.msra.mxu1 %v2163_v14  ;;  %v391_v33 = vld [vmem:[%s390_s26] sm:$0xff]  ;;  %v392_v34 = vld [vmem:[%s390_s26 + $0x8] sm:$0xff]  ;;  %v393_v41 = vld [vmem:[%s390_s26 + $0x10] sm:$0xff]  ;;  %vm2480_vm0 = vmmov 0   ;;  %s1215_s10 = scalar_lea.vmem [#allocation2], %s1751_s24  ;;  %vm1221_vm1 = vcmask 261120  }
  0x85   : >> { %723 = vmatprep.subr.bf16.mxu0 %v2164_v13  ;;  %776 = vmatprep.subr.bf16.mxu1 %v2167_v15  ;;  %v2196_v35 = vld [vmem:[#allocation8 + $0x164] ss:$24 sps:$4 sm:$0xff]   ;;  %v2193_v36 = vld [vmem:[#allocation8 + $0x8] ss:$24 sps:$4 sm:$0xff]   ;;  %v395_v37 = vpack.c.bf16 %v392_v34, %v391_v33  ;;  %v2205_v45 = vld [vmem:[#allocation8 + $0xd4] ss:$24 sps:$4 sm:$0xff]  }
  0x86   : >> { %v2194_v38 = vld [vmem:[#allocation8 + $0x160] ss:$24 sps:$4 sm:$0xff]   ;;  %v2197_v40 = vld [vmem:[#allocation8 + $0x130] ss:$24 sps:$4 sm:$0xff]   ;;  %v2202_v43 = vld [vmem:[#allocation8 + $0x104] ss:$24 sps:$4 sm:$0xff]  }
  0x87   : >> { %v394_v42 = vld [vmem:[%s390_s26 + $0x18] sm:$0xff]  ;;  %v2203_v47 = vld [vmem:[#allocation8 + $0xd0] ss:$24 sps:$4 sm:$0xff]   ;;  %v2218_v56 = vld [vmem:[#allocation11 + $0x78] sm:$0xff]   ;;  %s388_s11 = sadd.s32 1, %s2460_s11  }
  0x88   : >> { %724 = vmatpush1.bf16.msra.mxu0 %v2166_v16  ;;  %777 = vmatpush1.bf16.msra.mxu1 %v2169_v18  ;;  %v2200_v44 = vld [vmem:[#allocation8 + $0x100] ss:$24 sps:$4 sm:$0xff]   ;;  %v396_v46 = vpack.c.bf16 %v394_v42, %v393_v41  ;;  %v2208_v48 = vld [vmem:[#allocation8 + $0xa4] ss:$24 sps:$4 sm:$0xff]   ;;  %v2211_v50 = vld [vmem:[#allocation8 + $0x74] ss:$24 sps:$4 sm:$0xff]  }
  0x89   : >> { %725 = vmatprep.subr.bf16.mxu0 %v2170_v17  ;;  %778 = vmatprep.subr.bf16.mxu1 %v2173_v19  ;;  %v2206_v49 = vld [vmem:[#allocation8 + $0xa0] ss:$24 sps:$4 sm:$0xff]   ;;  %v2209_v51 = vld [vmem:[#allocation8 + $0x70] ss:$24 sps:$4 sm:$0xff]   ;;  %v2214_v52 = vld [vmem:[#allocation8 + $0x44] ss:$24 sps:$4 sm:$0xff]   ;;  %v447_v19 = vlaneseq }
  0x8a   : >> { %v2212_v53 = vld [vmem:[#allocation8 + $0x40] ss:$24 sps:$4 sm:$0xff]   ;;  %v2217_v54 = vld [vmem:[#allocation8 + $0x14] ss:$24 sps:$4 sm:$0xff]   ;;  %v2215_v55 = vld [vmem:[#allocation8 + $0x10] ss:$24 sps:$4 sm:$0xff]  }
  0x8b   : >> { %v2219_v57 = vld [vmem:[#allocation11 + $0x38] sm:$0xff]   ;;  %v2220_v58 = vld [vmem:[#allocation11 + $0x70] sm:$0xff]   ;;  %v2222_v60 = vld [vmem:[#allocation11 + $0x68] sm:$0xff]   ;;  %p385_p4 = scmp.ge.s32.totalorder %s388_s11, 2  }
  0x8c   : >> { %726 = vmatpush1.bf16.msra.mxu0 %v2172_v20  ;;  %779 = vmatpush1.bf16.msra.mxu1 %v2175_v22  ;;  %v2221_v59 = vld [vmem:[#allocation11 + $0x30] sm:$0xff]   ;;  %v2224_v61 = vld [vmem:[#allocation11 + $0xb8] sm:$0xff]   ;;  %v2223_v62 = vld [vmem:[#allocation11 + $0x28] sm:$0xff]   ;;  %vm2482_vm2 = vmmov (%p385_p4), 0   ;;  %s2772_s2 = smov (%p385_p4), 0  }
  0x8d   : >> { %727 = vmatprep.subr.bf16.mxu0 %v2176_v21  ;;  %780 = vmatprep.subr.bf16.mxu1 %v2179_v23  ;;  %v2225_v63 = vld [vmem:[#allocation11 + $0x60] sm:$0xff]   ;;  %v2227_v1 = vld [vmem:[#allocation11 + $0xb0] sm:$0xff]   ;;  %v2230_v2 = vld [vmem:[#allocation11 + $0xa8] sm:$0xff]   ;;  %v448_v21 = vshrl.u32 %v447_v19, 7 }
  0x8e   : >> { %v2228_v4 = vld [vmem:[#allocation11 + $0x58] sm:$0xff]   ;;  %v2231_v6 = vld [vmem:[#allocation11 + $0x50] sm:$0xff]   ;;  %v2233_v8 = vld [vmem:[#allocation11 + $0xa0] sm:$0xff]  }
  0x8f   : >> { %v2229_v5 = vld [vmem:[#allocation11 + $0x18] sm:$0xff]   ;;  %v2232_v7 = vld [vmem:[#allocation11 + $0x10] sm:$0xff]   ;;  %v2234_v9 = vld [vmem:[#allocation11 + $0x48] sm:$0xff]   ;;  %v465_v42 = vsub.s32 4, %v448_v21 }
  0x90   : >> { %728 = vmatpush1.bf16.msra.mxu0 %v2178_v24  ;;  %781 = vmatpush1.bf16.msra.mxu1 %v2181_v26  ;;  %v2235_v10 = vld [vmem:[#allocation11 + $0x8] sm:$0xff]   ;;  %v2236_v11 = vld [vmem:[#allocation11 + $0x98] sm:$0xff]   ;;  %v2237_v12 = vld [vmem:[#allocation11 + $0x40] sm:$0xff]   ;;  %v2717_v24 = vsub.s32 0, %v448_v21 }
  0x91   : >> { %729 = vmatprep.subr.bf16.mxu0 %v2182_v25  ;;  %782 = vmatprep.subr.bf16.mxu1 %v2185_v27  ;;  %v2238_v13 = vld [vmem:[#allocation11] sm:$0xff]   ;;  %v2239_v14 = vld [vmem:[#allocation11 + $0x90] sm:$0xff]   ;;  %v2240_v15 = vld [vmem:[#allocation11 + $0x88] sm:$0xff]  }
  0x92   : >> { %v2241_v16 = vld [vmem:[#allocation11 + $0x80] sm:$0xff]   ;;  %v445_v26 = vld [vmem:[#allocation10] sm:$0x3f] }
  0x94   : >> { %730 = vmatpush1.bf16.msra.mxu0 %v2184_v28  ;;  %783 = vmatpush1.bf16.msra.mxu1 %v2187_v29  ;;  %v453_v28 = vsub.s32 1, %v448_v21  ;;  %v457_v29 = vsub.s32 2, %v448_v21 }
  0x95   : >> { %731 = vmatprep.subr.bf16.mxu0 %v2188_v30  ;;  %784 = vmatprep.subr.bf16.mxu1 %v2191_v32  ;;  %v450_v30 = vrot.slane %v445_v26, %v2717_v24 }
  0x96   : >> { %v454_v33 = vrot.slane %v445_v26, %v453_v28  ;;  %v458_v34 = vrot.slane %v445_v26, %v457_v29 }
  0x98   : >> { %732 = vmatpush1.bf16.msra.mxu0 %v2190_v31  ;;  %785 = vmatpush1.bf16.msra.mxu1 %v2193_v36 }
  0x99   : >> { %823 = vmatprep.subr.bf16.mxu0 %v2196_v35  ;;  %1835 = vmatprep.subr.bf16.mxu1 %v2218_v56 }
  0x9b   : >> { %750 = vmatmul.mubr.bf16.vlgmr.msra.gmra.mxu0 %v395_v37  ;;  %803 = vmatmul.mubr.bf16.vlgmr.msra.gmra.mxu1 %v395_v37 }
  0x9c   : >> { %824 = vmatpush1.bf16.msra.mxu0 %v2194_v38  ;;  %759 = vmatprep.mubr.bf16.mxu0 %v2478_v3  ;;  %v461_v38 = vsub.s32 3, %v448_v21 }
  0x9d   : >> { %825 = vmatprep.subr.bf16.mxu0 %v2199_v39  ;;  %812 = vmatprep.mubr.bf16.mxu1 %v2478_v3 }
  0x9e   : >> { %1836 = vmatpush3.bf16.msra.mxu1 %v2219_v57 }
  0x9f   : >> { %1837 = vmatprep.subr.bf16.mxu1 %v2220_v58 }
  0xa0   : >> { %826 = vmatpush1.bf16.msra.mxu0 %v2197_v40 }
  0xa1   : >> { %827 = vmatprep.subr.bf16.mxu0 %v2202_v43 }
  0xa2   : >> { %1838 = vmatpush3.bf16.msra.mxu1 %v2221_v59 }
  0xa3   : >> { %760 = vmatmul.mubr.bf16.gmra.mxu0 %v396_v46  ;;  %813 = vmatmul.mubr.bf16.gmra.mxu1 %v396_v46 }
  0xa4   : >> { %828 = vmatpush1.bf16.msra.mxu0 %v2200_v44  ;;  %855 = vmatprep.mubr.bf16.mxu0 %v2478_v3 }
  0xa5   : >> { %829 = vmatprep.subr.bf16.mxu0 %v2205_v45  ;;  %1839 = vmatprep.subr.bf16.mxu1 %v2222_v60 }
  0xa6   : >> { %1840 = vmatpush3.bf16.msra.mxu1 %v2223_v62 }
  0xa7   : >> { %1841 = vmatprep.subr.bf16.mxu1 %v2225_v63 }
  0xa8   : >> { %830 = vmatpush1.bf16.msra.mxu0 %v2203_v47  ;;  %v469_v47 = vsub.s32 5, %v448_v21 }
  0xa9   : >> { %831 = vmatprep.subr.bf16.mxu0 %v2208_v48  ;;  %v462_v48 = vrot.slane %v445_v26, %v461_v38 }
  0xaa   : >> { %v470_v60 = vrot.slane %v445_v26, %v469_v47 }
  0xac   : >> { %832 = vmatpush1.bf16.msra.mxu0 %v2206_v49 }
  0xad   : >> { %833 = vmatprep.subr.bf16.mxu0 %v2211_v50 }
  0xb0   : >> { %834 = vmatpush1.bf16.msra.mxu0 %v2209_v51 }
  0xb1   : >> { %835 = vmatprep.subr.bf16.mxu0 %v2214_v52 }
  0xb4   : >> { %836 = vmatpush1.bf16.msra.mxu0 %v2212_v53  ;;  %v466_v53 = vrot.slane %v445_v26, %v465_v42 }
  0xb5   : >> { %837 = vmatprep.subr.bf16.mxu0 %v2217_v54 }
  0xb8   : >> { %838 = vmatpush1.bf16.msra.mxu0 %v2215_v55 }
  0xb9   : >> { %1917 = vmatprep.subr.bf16.mxu0 %v2224_v61 }
  0xbb   : >> { %856 = vmatmul.mubr.bf16.vlgmr.msra.gmra.mxu0 %v395_v37 }
  0xbc   : >> { %865 = vmatprep.mubr.bf16.mxu0 %v2478_v3  ;;  %1918 = vmatpush3.bf16.msra.mxu0 %v2224_v61  ;;  %v2226_v3 = vld [vmem:[#allocation11 + $0x20] sm:$0xff]  }
  0xbd   : >> { %1919 = vmatprep.subr.bf16.mxu0 %v2227_v1  ;;  %1842 = vmatpush3.bf16.msra.mxu1 %v2226_v3 }
  0xbe   : >> { %1843 = vmatprep.subr.bf16.mxu1 %v2228_v4 }
  0xc0   : >> { %1920 = vmatpush3.bf16.msra.mxu0 %v2227_v1 }
  0xc1   : >> { %1921 = vmatprep.subr.bf16.mxu0 %v2230_v2  ;;  %1844 = vmatpush3.bf16.msra.mxu1 %v2229_v5 }
  0xc2   : >> { %1845 = vmatprep.subr.bf16.mxu1 %v2231_v6 }
  0xc3   : >> { %866 = vmatmul.mubr.bf16.gmra.mxu0 %v396_v46 }
  0xc4   : >> { %1922 = vmatpush3.bf16.msra.mxu0 %v2230_v2 }
  0xc5   : >> { %1846 = vmatpush3.bf16.msra.mxu1 %v2232_v7  ;;  %1923 = vmatprep.subr.bf16.mxu0 %v2233_v8 }
  0xc6   : >> { %1847 = vmatprep.subr.bf16.mxu1 %v2234_v9 }
  0xc8   : >> { %1924 = vmatpush3.bf16.msra.mxu0 %v2233_v8 }
  0xc9   : >> { %1848 = vmatpush3.bf16.msra.mxu1 %v2235_v10  ;;  %1925 = vmatprep.subr.bf16.mxu0 %v2236_v11 }
  0xca   : >> { %1849 = vmatprep.subr.bf16.mxu1 %v2237_v12 }
  0xcc   : >> { %1926 = vmatpush3.bf16.msra.mxu0 %v2236_v11 }
  0xcd   : >> { %1850 = vmatpush3.bf16.msra.mxu1 %v2238_v13  ;;  %1927 = vmatprep.subr.bf16.mxu0 %v2239_v14 }
  0xd0   : >> { %1928 = vmatpush3.bf16.msra.mxu0 %v2239_v14 }
  0xd1   : >> { %1929 = vmatprep.subr.bf16.mxu0 %v2240_v15 }
  0xd4   : >> { %1930 = vmatpush3.bf16.msra.mxu0 %v2240_v15 }
  0xd5   : >> { %1931 = vmatprep.subr.bf16.mxu0 %v2241_v16 }
  0xd8   : >> { %1932 = vmatpush3.bf16.msra.mxu0 %v2241_v16 }
  0xd9   : > { %1959 = vmatprep.subr.mxu0 (%p385_p4), %v2477_v0 }
 0x15b   : >> { %v751_v17 = vpop.f32.mrf.mxu0  ;;  %v804_v22 = vpop.f32.mrf.mxu1 }
 0x15c   : >> { %v752_v36 = vadd.f32 %v751_v17, %v450_v30  ;;  %v805_v43 = vadd.f32 %v804_v22, %v458_v34 }
 0x15d   : >> { %v753_v18 = vpop.f32.mrf.mxu0  ;;  %v806_v25 = vpop.f32.mrf.mxu1 }
 0x15e   : >> { %v754_v40 = vadd.f32 %v753_v18, %v454_v33  ;;  %v876_v45 = vmax.f32 %v752_v36, 0.0  ;;  %v878_v54 = vmax.f32 %v805_v43, 0.0  ;;  %v807_v61 = vadd.f32 %v806_v25, %v462_v48 }
 0x15f   : >> { %v755_v20 = vpop.f32.mrf.mxu0  ;;  %v808_v31 = vpop.f32.mrf.mxu1 }
 0x160   : >> { %v756_v35 = vadd.f32 %v755_v20, %v450_v30  ;;  %v809_v49 = vadd.f32 %v808_v31, %v458_v34  ;;  %v877_v51 = vmax.f32 %v754_v40, 0.0  ;;  %v888_v58 = vmin.f32 %v876_v45, 6.0 }
 0x161   : >> { %v757_v23 = vpop.f32.mrf.mxu0  ;;  %v810_v37 = vpop.f32.mrf.mxu1  ;;  %v890_v6 = vmin.f32 %v878_v54, 6.0 }
 0x162   : >> { %v879_v44 = vmax.f32 %v756_v35, 0.0  ;;  %v758_v46 = vadd.f32 %v757_v23, %v454_v33  ;;  %v811_v56 = vadd.f32 %v810_v37, %v462_v48  ;;  %v881_v62 = vmax.f32 %v809_v49, 0.0 }
 0x163   : >> { %v761_v27 = vpop.f32.mrf.mxu0  ;;  %v814_v41 = vpop.f32.mrf.mxu1  ;;  %v889_v3 = vmin.f32 %v877_v51, 6.0  ;;  %v900_v15 = vmul.f32 %v888_v58, %v807_v61 }
 0x164   : >> { %v891_v55 = vmin.f32 %v879_v44, 6.0  ;;  %v880_v59 = vmax.f32 %v758_v46, 0.0  ;;  %v762_v63 = vadd.f32 %v761_v27, %v450_v30  ;;  %v815_v9 = vadd.f32 %v814_v41, %v458_v34 }
 0x165   : >> { %v763_v32 = vpop.f32.mrf.mxu0  ;;  %v816_v52 = vpop.f32.mrf.mxu1  ;;  %v893_v16 = vmin.f32 %v881_v62, 6.0  ;;  %v2479_v62 = vmov 0.0  }
 0x166   : >> { %v903_v7 = vmul.f32 %v891_v55, %v811_v56  ;;  %v764_v8 = vadd.f32 %v763_v32, %v454_v33  ;;  %v892_v11 = vmin.f32 %v880_v59, 6.0  ;;  %v882_v17 = vmax.f32 %v762_v63, 0.0  ;;  %1937 = vmatprep.subr.mxu1 %v2479_v62 }
 0x167   : >> { %v765_v39 = vpop.f32.mrf.mxu0  ;;  %v818_v4 = vpop.f32.mrf.mxu1  ;;  %v884_v28 = vmax.f32 %v815_v9, 0.0  ;;  %v817_v37 = vadd.f32 %v816_v52, %v462_v48 }
 0x168   : >> { %v766_v1 = vadd.f32 %v765_v39, %v450_v30  ;;  %v819_v20 = vadd.f32 %v818_v4, %v458_v34  ;;  %v912_v26 = vpack.c.bf16 %v903_v7, %v900_v15  ;;  %v883_v27 = vmax.f32 %v764_v8, 0.0 }
 0x169   : >> { %v767_v50 = vpop.f32.mrf.mxu0  ;;  %v820_v21 = vpop.f32.mrf.mxu1  ;;  %v894_v35 = vmin.f32 %v882_v17, 6.0  ;;  %v896_v44 = vmin.f32 %v884_v28, 6.0 }
 0x16a   : >> { %v768_v12 = vadd.f32 %v767_v50, %v454_v33  ;;  %v885_v18 = vmax.f32 %v766_v1, 0.0  ;;  %v821_v38 = vadd.f32 %v820_v21, %v462_v48  ;;  %v887_v40 = vmax.f32 %v819_v20, 0.0 }
 0x16b   : >> { %v895_v42 = vmin.f32 %v883_v27, 6.0  ;;  %v906_v49 = vmul.f32 %v894_v35, %v817_v37 }
 0x16c   : >> { %v886_v30 = vmax.f32 %v768_v12, 0.0  ;;  %v897_v36 = vmin.f32 %v885_v18, 6.0  ;;  %v899_v54 = vmin.f32 %v887_v40, 6.0  ;;  %v1388_v40 = vld [vmem:[#allocation13 + $0x68] sm:$0xff] (%p385_p4) }
 0x16e   : >> { %v898_v45 = vmin.f32 %v886_v30, 6.0  ;;  %v909_v50 = vmul.f32 %v897_v36, %v821_v38  ;;  %v1390_v38 = vld [vmem:[#allocation13 + $0x78] sm:$0xff] (%p385_p4) }
 0x170   : >> { %v915_v59 = vpack.c.bf16 %v909_v50, %v906_v49  ;;  %v1379_v49 = vld [vmem:[#allocation13 + $0x20] sm:$0xff] (%p385_p4)  ;;  %v1378_v50 = vld [vmem:[#allocation13 + $0x18] sm:$0xff] (%p385_p4) }
 0x17b   : >> { %v857_v57 = vpop.f32.mrf.mxu0 }
 0x17c   : >> { %v858_v5 = vadd.f32 %v857_v57, %v466_v53 }
 0x17d   : >> { %v859_v2 = vpop.f32.mrf.mxu0 }
 0x17e   : >> { %v860_v13 = vadd.f32 %v859_v2, %v470_v60  ;;  %v901_v22 = vmul.f32 %v889_v3, %v858_v5 }
 0x17f   : >> { %v861_v10 = vpop.f32.mrf.mxu0 }
 0x180   : >> { %v862_v14 = vadd.f32 %v861_v10, %v466_v53  ;;  %v902_v31 = vmul.f32 %v890_v6, %v860_v13 }
 0x181   : >> { %v863_v19 = vpop.f32.mrf.mxu0 }
 0x182   : >> { %v904_v23 = vmul.f32 %v892_v11, %v862_v14  ;;  %v864_v25 = vadd.f32 %v863_v19, %v470_v60 }
 0x183   : >> { %v867_v29 = vpop.f32.mrf.mxu0 }
 0x184   : >> { %v905_v32 = vmul.f32 %v893_v16, %v864_v25  ;;  %v913_v33 = vpack.c.bf16 %v904_v23, %v901_v22  ;;  %v868_v41 = vadd.f32 %v867_v29, %v466_v53  ;;  %v2481_v25 = vmov 1.0   ;;  %v1220_v29 = vld [vmem:[#allocation3] sm:$0x1] }
 0x185   : >> { %v869_v39 = vpop.f32.mrf.mxu0 }
 0x186   : >> { %1149 = vmatprep.mubr.bf16.mxu1 %v913_v33  ;;  %v914_v34 = vpack.c.bf16 %v905_v32, %v902_v31  ;;  %v870_v46 = vadd.f32 %v869_v39, %v470_v60  ;;  %v907_v55 = vmul.f32 %v895_v42, %v868_v41  ;;  %v1297_v33 = vld [vmem:[#allocation4] sm:$0x1]  ;;  %v1389_v39 = vld [vmem:[#allocation13 + $0x70] sm:$0xff] (%p385_p4)  ;;  %v1387_v41 = vld [vmem:[#allocation13 + $0x60] sm:$0xff] (%p385_p4) }
 0x187   : >> { %v871_v43 = vpop.f32.mrf.mxu0  ;;  %1150 = vmatmul.mubr.bf16.vlgmr.msra.gmra.mxu1 %v912_v26  ;;  %v1385_v42 = vld [vmem:[#allocation13 + $0x50] sm:$0xff] (%p385_p4) }
 0x188   : >> { %v872_v47 = vadd.f32 %v871_v43, %v466_v53  ;;  %1933 = vmatprep.mubr.bf16.mxu0 %v914_v34  ;;  %v908_v56 = vmul.f32 %v896_v44, %v870_v46  ;;  %v1386_v34 = vld [vmem:[#allocation13 + $0x58] sm:$0xff] (%p385_p4)  ;;  %v1384_v43 = vld [vmem:[#allocation13 + $0x48] sm:$0xff] (%p385_p4)  ;;  %v1383_v44 = vld [vmem:[#allocation13 + $0x40] sm:$0xff] (%p385_p4) }
 0x189   : >> { %v873_v51 = vpop.f32.mrf.mxu0  ;;  %v1381_v46 = vld [vmem:[#allocation13 + $0x30] sm:$0xff] (%p385_p4) }
 0x18a   : >> { %v910_v52 = vmul.f32 %v898_v45, %v872_v47  ;;  %v874_v48 = vadd.f32 %v873_v51, %v470_v60  ;;  %v1800_v60 = vld [vmem:[%s2839_s4] ss:$0 sm:$0xff]  ;;  %v1380_v47 = vld [vmem:[#allocation13 + $0x28] sm:$0xff] (%p385_p4)  ;;  %v1377_v51 = vld [vmem:[#allocation13 + $0x10] sm:$0xff] (%p385_p4) }
 0x18b   : > { %v1382_v45 = vld [vmem:[#allocation13 + $0x38] sm:$0xff] (%p385_p4) }
 0x18c   : >> { %v911_v57 = vmul.f32 %v899_v54, %v874_v48  ;;  %v916_v58 = vpack.c.bf16 %v910_v52, %v907_v55  ;;  %v1376_v54 = vld [vmem:[#allocation13 + $0x8] sm:$0xff] (%p385_p4)  ;;  %v1375_v55 = vld [vmem:[#allocation13] sm:$0xff] (%p385_p4) }
 0x18e   : >> { %v917_v61 = vpack.c.bf16 %v911_v57, %v908_v56  ;;  %1157 = vmatprep.mubr.bf16.mxu1 %v916_v58 }
 0x18f   : >> { %1158 = vmatmul.mubr.bf16.gmra.mxu1 %v915_v59 }
 0x190   : >> { %1934 = vmatmul.mubr.bf16.vlgmr.msra.gmra.mxu0 %v917_v61  ;;  %1945 = vmatprep.mubr.msk.f32.mxu1 %vm2480_vm0, %v2479_v62 }
 0x191   : > { %1960 = vmatpush3.msra.mxu0 (%p385_p4), %v1390_v38  ;;  %1991 = vmatprep.mubr.msk.f32.mxu0 (%p385_p4), %vm2482_vm2, %v2477_v0 }
 0x192   : > { %1961 = vmatprep.subr.mxu0 (%p385_p4), %v2477_v0 }
 0x193   : > { %1962 = vmatpush3.msra.mxu0 (%p385_p4), %v1389_v39 }
 0x194   : > { %1963 = vmatprep.subr.mxu0 (%p385_p4), %v2477_v0 }
 0x195   : > { %1964 = vmatpush3.msra.mxu0 (%p385_p4), %v1388_v40 }
 0x196   : > { %1965 = vmatprep.subr.mxu0 (%p385_p4), %v2477_v0 }
 0x197   : > { %1966 = vmatpush3.msra.mxu0 (%p385_p4), %v1387_v41 }
 0x198   : > { %1967 = vmatprep.subr.mxu0 (%p385_p4), %v2477_v0 }
 0x199   : > { %1968 = vmatpush3.msra.mxu0 (%p385_p4), %v1386_v34 }
 0x19a   : > { %1969 = vmatprep.subr.mxu0 (%p385_p4), %v2477_v0 }
 0x19b   : > { %1970 = vmatpush3.msra.mxu0 (%p385_p4), %v1385_v42 }
 0x19c   : > { %1971 = vmatprep.subr.mxu0 (%p385_p4), %v2477_v0 }
 0x19d   : > { %1972 = vmatpush3.msra.mxu0 (%p385_p4), %v1384_v43 }
 0x19e   : > { %1973 = vmatprep.subr.mxu0 (%p385_p4), %v2477_v0 }
 0x19f   : > { %1974 = vmatpush3.msra.mxu0 (%p385_p4), %v1383_v44 }
 0x1a0   : > { %1975 = vmatprep.subr.mxu0 (%p385_p4), %v2477_v0 }
 0x1a1   : > { %1976 = vmatpush3.msra.mxu0 (%p385_p4), %v1382_v45 }
 0x1a2   : > { %1977 = vmatprep.subr.mxu0 (%p385_p4), %v2477_v0 }
 0x1a3   : > { %1978 = vmatpush3.msra.mxu0 (%p385_p4), %v1381_v46 }
 0x1a4   : > { %1979 = vmatprep.subr.mxu0 (%p385_p4), %v2477_v0 }
 0x1a5   : > { %1980 = vmatpush3.msra.mxu0 (%p385_p4), %v1380_v47 }
 0x1a6   : > { %1981 = vmatprep.subr.mxu0 (%p385_p4), %v2477_v0 }
 0x1a7   : > { %1982 = vmatpush3.msra.mxu0 (%p385_p4), %v1379_v49 }
 0x1a8   : > { %1983 = vmatprep.subr.mxu0 (%p385_p4), %v2477_v0 }
 0x1a9   : > { %1984 = vmatpush3.msra.mxu0 (%p385_p4), %v1378_v50 }
 0x1aa   : > { %1985 = vmatprep.subr.mxu0 (%p385_p4), %v2477_v0 }
 0x1ab   : > { %1986 = vmatpush3.msra.mxu0 (%p385_p4), %v1377_v51 }
 0x1ac   : > { %1987 = vmatprep.subr.mxu0 (%p385_p4), %v2477_v0 }
 0x1ad   : > { %1988 = vmatpush3.msra.mxu0 (%p385_p4), %v1376_v54 }
 0x1ae   : > { %1989 = vmatprep.subr.mxu0 (%p385_p4), %v2477_v0 }
 0x1af   : > { %1990 = vmatpush3.msra.mxu0 (%p385_p4), %v1375_v55 }
 0x247   : >> { %v1851_v53 = vpop.f32.mrf.mxu1 }
 0x249   : >> { %v1852_v63 = vpop.f32.mrf.mxu1 }
 0x24a   : >> { %v1853_v2 = vadd.f32 %v1852_v63, %v1851_v53 }
 0x24b   : >> { %v1854_v1 = vpop.f32.mrf.mxu1 }
 0x24c   : >> { %v1152_v8 = vadd.f32 %v1853_v2, %v1800_v60 }
 0x24d   : >> { %v1855_v3 = vpop.f32.mrf.mxu1 }
 0x24e   : >> { %v1856_v6 = vadd.f32 %v1855_v3, %v1854_v1  ;;  %v1540_v3 = vld [vmem:[%s2841_s6] sm:$0x1] (%p385_p4) }
 0x24f   : >> { %v1857_v4 = vpop.f32.mrf.mxu1 }
 0x250   : >> { %v1935_v5 = vpop.f32.mrf.mxu0  ;;  %v1155_v16 = vadd.f32 %v1856_v6, %v1800_v60 }
 0x251   : >> { %v1858_v7 = vpop.f32.mrf.mxu1 }
 0x252   : >> { %v1859_v9 = vadd.f32 %v1858_v7, %v1857_v4  ;;  %v1200_v10 = vpop.f32.mrf.mxu0 }
 0x253   : >> { %v1201_v11 = vadd.f32 %v1200_v10, %v1152_v8  ;;  %v1860_v12 = vpop.f32.mrf.mxu1 }
 0x254   : >> { %v1160_v13 = vadd.f32 %v1859_v9, %v1800_v60  ;;  %v1936_v14 = vpop.f32.mrf.mxu0 }
 0x255   : >> { %1216 = vst [vmem:[%s1215_s10] sm:$0xff] %v1201_v11  ;;  %v1861_v15 = vpop.f32.mrf.mxu1  ;;  %v1298_v28 = vmul.f32 %v1201_v11, %v1201_v11 }
 0x256   : >> { %v1209_v17 = vadd.f32 %v1935_v5, %v1160_v13  ;;  %v1862_v18 = vadd.f32 %v1861_v15, %v1860_v12  ;;  %v1203_v19 = vpop.f32.mrf.mxu0 }
 0x257   : >> { %v1204_v20 = vadd.f32 %v1203_v19, %v1155_v16 }
 0x258   : >> { %1218 = vst [vmem:[%s1215_s10 + $0x10] sm:$0xff] %v1209_v17  ;;  %v1163_v21 = vadd.f32 %v1862_v18, %v1800_v60  ;;  %v1300_v26 = vmul.f32 %v1209_v17, %v1209_v17 }
 0x259   : >> { %1217 = vst [vmem:[%s1215_s10 + $0x8] sm:$0xff] %v1204_v20  ;;  %v1299_v27 = vmul.f32 %v1204_v20, %v1204_v20 }
 0x25a   : >> { %v1212_v22 = vadd.f32 %v1936_v14, %v1163_v21 }
 0x25c   : >> { %1219 = vst [vmem:[%s1215_s10 + $0x18] sm:$0xff] %v1212_v22  ;;  %1938 = vmatpush3.msra.mxu1 %v1212_v22  ;;  %v1301_v23 = vmul.f32 %v1212_v22, %v1212_v22 }
 0x25d   : >> { %1939 = vmatprep.subr.mxu1 %v2479_v62 }
 0x25e   : >> { %1940 = vmatpush3.msra.mxu1 %v1209_v17 }
 0x25f   : >> { %1941 = vmatprep.subr.mxu1 %v2479_v62 }
 0x260   : >> { %1942 = vmatpush3.msra.mxu1 %v1204_v20 }
 0x261   : >> { %1943 = vmatprep.subr.mxu1 %v2479_v62 }
 0x262   : >> { %1944 = vmatpush3.msra.mxu1 %v1201_v11 }
 0x263   : >> { %1948 = vmatprep.subr.mxu1 %v2479_v62  ;;  %1946 = vmatmul.mubr.msk.f32.vlgmr.msra.gmra.mxu1 %vm1221_vm1, %v2481_v25 }
 0x264   : >> { %1949 = vmatpush3.msra.mxu1 %v1301_v23  ;;  %1956 = vmatprep.mubr.msk.f32.mxu1 %vm2480_vm0, %v2479_v62 }
 0x265   : >> { %1950 = vmatprep.subr.mxu1 %v2479_v62 }
 0x266   : >> { %1951 = vmatpush3.msra.mxu1 %v1300_v26 }
 0x267   : >> { %1952 = vmatprep.subr.mxu1 %v2479_v62 }
 0x268   : >> { %1953 = vmatpush3.msra.mxu1 %v1299_v27 }
 0x269   : >> { %1954 = vmatprep.subr.mxu1 %v2479_v62 }
 0x26a   : >> { %1955 = vmatpush3.msra.mxu1 %v1298_v28 }
 0x26b   : >> { %1957 = vmatmul.mubr.msk.f32.vlgmr.msra.gmra.mxu1 %vm1221_vm1, %v2481_v25  ;;  %1994 = vmatprep.subr.mxu1 (%p385_p4), %v2477_v0 }
 0x26c   : > { %1995 = vmatpush3.msra.mxu1 (%p385_p4), %v1390_v38  ;;  %2026 = vmatprep.mubr.msk.f32.mxu1 (%p385_p4), %vm2482_vm2, %v2477_v0 }
 0x26d   : > { %1996 = vmatprep.subr.mxu1 (%p385_p4), %v2477_v0 }
 0x26e   : > { %1997 = vmatpush3.msra.mxu1 (%p385_p4), %v1389_v39 }
 0x26f   : > { %1998 = vmatprep.subr.mxu1 (%p385_p4), %v2477_v0 }
 0x270   : > { %1999 = vmatpush3.msra.mxu1 (%p385_p4), %v1388_v40 }
 0x271   : > { %2000 = vmatprep.subr.mxu1 (%p385_p4), %v2477_v0 }
 0x272   : > { %2001 = vmatpush3.msra.mxu1 (%p385_p4), %v1387_v41 }
 0x273   : > { %2002 = vmatprep.subr.mxu1 (%p385_p4), %v2477_v0 }
 0x274   : > { %2003 = vmatpush3.msra.mxu1 (%p385_p4), %v1386_v34 }
 0x275   : > { %2004 = vmatprep.subr.mxu1 (%p385_p4), %v2477_v0 }
 0x276   : > { %2005 = vmatpush3.msra.mxu1 (%p385_p4), %v1385_v42 }
 0x277   : > { %2006 = vmatprep.subr.mxu1 (%p385_p4), %v2477_v0 }
 0x278   : > { %2007 = vmatpush3.msra.mxu1 (%p385_p4), %v1384_v43 }
 0x279   : > { %2008 = vmatprep.subr.mxu1 (%p385_p4), %v2477_v0 }
 0x27a   : > { %2009 = vmatpush3.msra.mxu1 (%p385_p4), %v1383_v44 }
 0x27b   : > { %2010 = vmatprep.subr.mxu1 (%p385_p4), %v2477_v0 }
 0x27c   : > { %2011 = vmatpush3.msra.mxu1 (%p385_p4), %v1382_v45 }
 0x27d   : > { %2012 = vmatprep.subr.mxu1 (%p385_p4), %v2477_v0 }
 0x27e   : > { %2013 = vmatpush3.msra.mxu1 (%p385_p4), %v1381_v46 }
 0x27f   : > { %2014 = vmatprep.subr.mxu1 (%p385_p4), %v2477_v0 }
 0x280   : > { %2015 = vmatpush3.msra.mxu1 (%p385_p4), %v1380_v47 }
 0x281   : > { %2016 = vmatprep.subr.mxu1 (%p385_p4), %v2477_v0 }
 0x282   : > { %2017 = vmatpush3.msra.mxu1 (%p385_p4), %v1379_v49 }
 0x283   : > { %2018 = vmatprep.subr.mxu1 (%p385_p4), %v2477_v0 }
 0x284   : > { %2019 = vmatpush3.msra.mxu1 (%p385_p4), %v1378_v50 }
 0x285   : > { %2020 = vmatprep.subr.mxu1 (%p385_p4), %v2477_v0 }
 0x286   : > { %2021 = vmatpush3.msra.mxu1 (%p385_p4), %v1377_v51 }
 0x287   : > { %2022 = vmatprep.subr.mxu1 (%p385_p4), %v2477_v0 }
 0x288   : > { %2023 = vmatpush3.msra.mxu1 (%p385_p4), %v1376_v54 }
 0x289   : > { %2024 = vmatprep.subr.mxu1 (%p385_p4), %v2477_v0  ;;  %v1542_v0 = vld [vmem:[%s2842_s7] sm:$0x1] (%p385_p4) }
 0x28a   : > { %2025 = vmatpush3.msra.mxu1 (%p385_p4), %v1375_v55 }
 0x323   : >> { %v1291_v30 = vpop.f32.mrf.mxu1 }
 0x324   : >> { %v1295_v31 = vadd.f32 %v1291_v30, %v1220_v29 }
 0x325   : >> { %v1947_v32 = vpop.f32.mrf.mxu1 }
 0x326   : >> { %1296 = vst [vmem:[#allocation3] sm:$0x1] %v1295_v31 }
 0x32a   : > { %387 = sbr.rel (!%p385_p4) target bundleno = 121 (0x79), region = 132 }
 0x32b   : >> { %v1368_v35 = vpop.f32.mrf.mxu1 }
 0x32c   : >> { %v1372_v36 = vadd.f32 %v1368_v35, %v1297_v33 }
 0x32d   : >> { %v1958_v37 = vpop.f32.mrf.mxu1  ;;  %v1374_v52 = vld [vmem:[#allocation3] sm:$0x1] (%p385_p4) }
 0x32e   : >> { %1373 = vst [vmem:[#allocation4] sm:$0x1] %v1372_v36  ;;  %1992 = vmatmul.mubr.f32.vlgmr.msra.gmra.mxu0 (%p385_p4), %v1374_v52 }
 0x335   : > { %v1461_v48 = vld [vmem:[#allocation4] sm:$0x1] }
 0x336   : > { %2027 = vmatmul.mubr.f32.vlgmr.msra.gmra.mxu1 %v1461_v48 }
 0x3ee   : > { %v1457_v56 = vpop.f32.mrf.mxu0 }
 0x3ef   : > { %v1533_v58 = vmul.f32 0.00390625, %v1457_v56 }
 0x3f0   : > { %v1993_v61 = vpop.f32.mrf.mxu0 }
 0x3f1   : > { %v1535_v53 = vmul.f32 %v1533_v58, %v1533_v58 }
 0x3f6   : > { %v1528_v57 = vpop.f32.mrf.mxu1 }
 0x3f7   : > { %v1534_v59 = vmul.f32 0.00390625, %v1528_v57 }
 0x3f8   : > { %v2028_v62 = vpop.f32.mrf.mxu1 }
 0x3f9   : > { %v1536_v63 = vsub.f32 %v1534_v59, %v1535_v53 }
 0x3fb   : > { %v1537_v1 = vmax.f32 %v1536_v63, 0.0 }
 0x3fd   : > { %v1538_v2 = vadd.f32 1e-05, %v1537_v1 }
 0x3ff   : > { %2242 = vrsqrt.f32 %v1538_v2 }
 0x40c   : > { %v2243_v60 = vpop.eup %2242 }
 0x40d   : > { %v1541_v4 = vmul.f32 %v2243_v60, %v1540_v3 }
 0x40f   : > { %v1543_v5 = vmul.f32 %v1541_v4, %v1533_v58 }
 0x411   : > { %v1544_v6 = vsub.f32 %v1542_v0, %v1543_v5 }
 0x412 LB: >> { %v1565_v7 = vrot.slane %v1541_v4, %v2717_v24  ;;  %s1827_s18 = sshll.u32 %s2464_s2, 5  ;;  %s1550_s2 = sadd.s32 1, %s2464_s2   ;;  %s2464_s2 = sphi %s2772_s2, %s1550_s2  }
 0x413   : >> { %s1557_s11 = scalar_lea.vmem %s2684_s23, %s1827_s18 [#allocation5]  ;;  %v1574_v8 = vrot.slane %v1544_v6, %v2717_v24  ;;  %s1552_s24 = scalar_lea.vmem [#allocation2], %s1827_s18 }
 0x414   : >> { %v1553_v9 = vld [vmem:[%s1552_s24] sm:$0xff]  ;;  %v1554_v10 = vld [vmem:[%s1552_s24 + $0x8] sm:$0xff]  ;;  %v1555_v13 = vld [vmem:[%s1552_s24 + $0x10] sm:$0xff]  ;;  %s1584_s26 = scalar_lea.vmem %s2700_s13, %s1827_s18 [#allocation14]  ;;  %p1547_p8 = scmp.ge.s32.totalorder %s1550_s2, 2  }
 0x415   : >> { %v1566_v11 = vmul.f32 %v1565_v7, %v1553_v9  ;;  %v1567_v12 = vmul.f32 %v1565_v7, %v1554_v10  ;;  %v1558_v14 = vld [vmem:[%s1557_s11] sm:$0xff]  ;;  %v1559_v15 = vld [vmem:[%s1557_s11 + $0x8] sm:$0xff]  ;;  %v1568_v16 = vmul.f32 %v1565_v7, %v1555_v13  ;;  %v1556_v17 = vld [vmem:[%s1552_s24 + $0x18] sm:$0xff]  ;;  %s1834_s15 = sshll.u32 (%p1547_p8), %s2552_s9, 10  ;;  %s1603_s20 = sshll.u32 (%p1547_p8), %s2700_s13, 4  ;;  %s2792_s20 = int_to_ptr.vmem [resolvable:$true] %s1603_s20 }
 0x416   : >> { %v1560_v20 = vld [vmem:[%s1557_s11 + $0x10] sm:$0xff]  ;;  %v1569_v21 = vmul.f32 %v1565_v7, %v1556_v17  ;;  %v1561_v23 = vld [vmem:[%s1557_s11 + $0x18] sm:$0xff]  ;;  %s2789_s21 = scalar_lea.hbm (%p1547_p8), %s2843_s8, %s1834_s15  ;;  %s1590_s25 = scalar_lea.sflag (%p1547_p8), [#allocation7], %s2680_s1 }
 0x417   : >> { %v1576_v18 = vadd.f32 %v1574_v8, %v1566_v11  ;;  %v1577_v19 = vadd.f32 %v1574_v8, %v1567_v12  ;;  %v1578_v22 = vadd.f32 %v1574_v8, %v1568_v16  ;;  %s2376_s22 = scalar_lea.vmem (%p1547_p8), %s2792_s20, 1024  ;;  %p2869_p6 = scmp.ne.s32.totalorder (%p1547_p8), %s2859_s16, 0 }
 0x418   : >> { %v1579_v27 = vadd.f32 %v1574_v8, %v1569_v21  ;;  %1549 = sbr.rel (!%p1547_p8) target bundleno = 1042 (0x412), region = 143  ;;  %p2377_p12 = scmp.ne.s32.totalorder (%p1547_p8), %s2792_s20, %s2376_s22 }
 0x419   : >> { %v1580_v25 = vadd.f32 %v1576_v18, %v1558_v14  ;;  %v1581_v26 = vadd.f32 %v1577_v19, %v1559_v15  ;;  %v1582_v28 = vadd.f32 %v1578_v22, %v1560_v20  ;;  %s2483_s23 = smov (%p1547_p8), [#allocation14]  }
 0x41a   : >> { %v1583_v29 = vadd.f32 %v1579_v27, %v1561_v23  ;;  %p2378_p3 = pnand (%p1547_p8), %p2377_p12, %p2869_p6  ;;  %s2380_s2 = sshll.u32 (%p1547_p8), %s2483_s23, 4  ;;  %s2381_s2 = int_to_ptr.vmem [resolvable:$false] %s2380_s2 }
 0x41b   : >> { %1585 = vst [vmem:[%s1584_s26] sm:$0xff] %v1580_v25  ;;  %1586 = vst [vmem:[%s1584_s26 + $0x8] sm:$0xff] %v1581_v26  ;;  %s2382_s9 = scalar_lea.vmem (%p1547_p8), %s2381_s2, 2048  ;;  %p2383_p13 = scmp.lt.s32.totalorder (%p1547_p8), %s2792_s20, %s2381_s2 }
 0x41c   : >> { %1587 = vst [vmem:[%s1584_s26 + $0x10] sm:$0xff] %v1582_v28  ;;  %1588 = vst [vmem:[%s1584_s26 + $0x18] sm:$0xff] %v1583_v29  ;;  %p2379_p9 = pneg (%p1547_p8), %p2378_p3  ;;  %p2384_p5 = scmp.lt.s32.totalorder (%p1547_p8), %s2382_s9, %s2376_s22 }
 0x41e   : > { %p2385_p0 = por %p2384_p5, %p2383_p13 }
 0x420   : > { %p2386_p7 = pnand %p2385_p0, %p2379_p9 }
 0x422   : > { %2389 = shalt.err (!%p2386_p7)
}
 0x423   : > { %s2390_s13 = scalar_lea.hbm %s2789_s21, 1024  ;;  %s2394_s24 = scalar_lea.hbm %s2843_s8, 2048 }
 0x424   : > { %p2391_p11 = scmp.ne.s32.totalorder %s2789_s21, %s2390_s13  ;;  %p2395_p2 = scmp.lt.s32.totalorder %s2789_s21, %s2843_s8 }
 0x425   : > { %p2396_p4 = scmp.lt.s32.totalorder %s2394_s24, %s2390_s13 }
 0x426   : > { %p2392_p10 = pnand %p2391_p11, %p2869_p6 }
 0x427   : > { %p2397_p8 = por %p2396_p4, %p2395_p2 }
 0x428   : > { %p2393_p1 = pneg %p2392_p10 }
 0x42a   : > { %p2398_p12 = pnand %p2397_p8, %p2393_p1 }
 0x42c   : > { %2401 = shalt.err (!%p2398_p12)
}
 0x42d   : > { %s2484_s17 = smov 128   ;;  %s2485_s10 = smov 8  }
 0x42e   : > { %2047 = dma.vmem_to_hbm [thread:$0]  (%p2869_p6), %s2792_s20, 1024, %s2789_s21, %s1590_s25, %s2484_s17, %s2484_s17, %s2485_s10  }
 0x42f PF: > { %s1618_s22 = sand.u32 1, %s2444_s27   ;;  %p2870_p3 = scmp.ne.s32.totalorder %s2853_s12, 0 }
 0x430   : > { %p2871_p9 = scmp.ge.s32.totalorder %s2456_s30, 2  ;;  %s1619_s23 = scalar_lea.sflag [#allocation7], %s1618_s22 }
 0x432   : > { %p2067_p13 = pnand %p2871_p9, %p2870_p3 }
 0x434   : > { %p2068_p5 = pneg %p2067_p13 }
 0x436   : > { %2439 = dma.done.wait (%p2068_p5), %s1619_s23, 1024  }
 0x437   : > { %2441 = vsyncadd (%p2068_p5), %s1619_s23, 4294966272  ;;  %p23_p0 = scmp.ge.s32.totalorder %s2622_s14, 4   ;;  %s2872_s27 = smov %s2448_s28 }
 0x438   : > { %s2873_s28 = smov %s2452_s29  ;;  %s2874_s29 = smov %s2631_s19 }
 0x439   : > { %s2875_s30 = smov %s2622_s14  ;;  %25 = sbr.rel (!%p23_p0) target bundleno = 10 (0xa), region = 154 }
 0x43e   :  { %1624 = vsyncpa [#allocation6], 1 }
 0x43f   :  { %1626 = vsyncpa [#allocation6 + $0x1], 1 }
 0x440   :  { %1627 = vsyncpa [#allocation9], 1 }
 0x441   :  { %1628 = vsyncpa [#allocation12], 1 }
 0x442   :  { %1629 = vsyncpa [#allocation7], 1 }
 0x443   :  { %1631 = vsyncpa [#allocation7 + $0x1], 1 }

</bundles_post_ra>
